<compile_context>
chip_gen: v5e
topology: v5e:2x2
jax: 0.10.0
libtpu: 0.0.40
codegen_flags: <defaults>
</compile_context>

<pallas_src>
import functools
import numpy as np
import jax
import jax.numpy as jnp
from jax import lax
from jax.experimental import pallas as pl
from jax.experimental.pallas import tpu as pltpu


# ----------------------------------------------------------------------------
# Pallas kernel: direct k x k "SAME" conv with in-kernel shifted taps.
# ----------------------------------------------------------------------------

def _conv_taps_kernel(w_ref, b_ref, x_ref, o_ref, *, k, W, HW, P):
    """One batch image per grid step.

    w_ref : (k*k, Cout, Cin) f32  per-tap weight matrices (Fastfood ray already
                                  folded in by the wrapper)
    b_ref : (Cout, 1)        f32  bias (Fastfood ray folded in)
    x_ref : (Cin, PADLEN)    f32  one image, rows flattened with stride W,
                                  P zero rows top/bottom plus P zero elements
                                  of front padding, so every tap slice below is
                                  in-bounds; PADLEN is 128-aligned.
    o_ref : (Cout, HW)       f32  conv output for this image (lane dim = H*W)
    """
    cout = w_ref.shape[1]
    # column (w) coordinate of every output position, for edge masking
    colw = lax.broadcasted_iota(jnp.int32, (1, HW), 1) % W

    acc = jnp.zeros((cout, HW), jnp.float32)
    for kw in range(k):
        acc_kw = jnp.zeros((cout, HW), jnp.float32)
        for kh in range(k):
            off = kh * W + kw                      # tap offset for output p=0
            tap = x_ref[:, pl.ds(off, HW)]         # (Cin, HW)
            acc_kw = acc_kw + jnp.dot(w_ref[kh * k + kw], tap,
                                      preferred_element_type=jnp.float32)
        # Horizontal-wrap fixup: with stride-W flattening, off-center taps read
        # the neighbouring row's opposite edge at the image border -> zero them.
        # (Masks applied on the f32 partial sums -> safe on v5e's VPU too.)
        if kw < P:
            acc_kw = jnp.where(colw < (P - kw), 0.0, acc_kw)
        elif kw > P:
            acc_kw = jnp.where(colw >= (W + P - kw), 0.0, acc_kw)
        acc = acc + acc_kw

    o_ref[...] = acc + b_ref[...]


# ----------------------------------------------------------------------------
# Init-time precompute of the frozen Fastfood operators
# ----------------------------------------------------------------------------

def _hadamard_matrix(n):
    h = np.array([[1.0]], dtype=np.float64)
    while h.shape[0] < n:
        h = np.block([[h, h], [h, -h]])
    return h


def _fastfood_dense_map(dd, DD, BB, Pi, GG, divisor, LL):
    """(dd, DD) f32 matrix M with  theta @ M == fastfood_torched(theta, DD, vars)."""
    B = np.asarray(BB, np.float64)
    G = np.asarray(GG, np.float64)
    Pi_np = np.asarray(Pi)
    H = _hadamard_matrix(LL)
    P = np.zeros((LL, LL), np.float64)
    P[Pi_np, np.arange(LL)] = 1.0                 # (x @ P)[i] = x[Pi[i]]
    scale = 1.0 / (float(divisor) * np.sqrt(float(DD) / float(LL)))
    M = (np.diag(B) @ H @ P @ np.diag(G) @ H) * scale          # (LL, LL)
    n = min(dd, LL)                               # F.pad with negative pad crops
    Mt = np.zeros((dd, DD), np.float64)
    Mt[:n, :] = M[:n, :DD]
    return Mt.astype(np.float32)


def fastfood_vars_jax(DD, key):
    """Deterministic equivalent of fastfood_vars(DD)."""
    ll = int(np.ceil(np.log2(DD))) if DD > 1 else 0
    LL = 2 ** ll
    kb, kp, kg = jax.random.split(key, 3)
    BB = (jax.random.randint(kb, (LL,), 0, 2) * 2 - 1).astype(jnp.float32)
    Pi = jax.random.permutation(kp, LL)
    GG = jax.random.normal(kg, (LL,), jnp.float32)
    divisor = jnp.sqrt(LL * jnp.sum(GG ** 2))
    return BB, Pi, GG, divisor, LL


# ----------------------------------------------------------------------------
# Jitted forward: tiny wrapper-side Fastfood ray + one pallas_call for the conv
# ----------------------------------------------------------------------------

@functools.partial(jax.jit, static_argnums=(4,))
def _forward(theta2d, m_all, v0_all, x_nchw, k):
    N, Cin, H, W = x_nchw.shape
    P = k // 2
    HW = H * W
    DDtot = v0_all.shape[0]
    Cout = DDtot // (k * k * Cin + 1)
    DDw = k * k * Cout * Cin

    # Fastfood re-parameterization, hoisted out of the per-tile kernel body:
    # one (1, dd) x (dd, DDw+Cout) matmul producing the effective conv params.
    v = v0_all + (theta2d @ m_all)[0]
    w_taps = v[:DDw].reshape(k * k, Cout, Cin)     # tap-major (kh*k+kw, o, ci)
    bias = v[DDw:].reshape(Cout, 1)

    # Activations: single pass — pad rows by P, flatten spatial with stride W,
    # pad the flat axis (front P, back up to a 128 multiple) so every in-kernel
    # tap slice is in-bounds.  No im2col duplication.
    flat_len = (H + 2 * P) * W
    padlen = ((flat_len + 2 * P + 127) // 128) * 128
    xflat = jnp.pad(x_nchw, ((0, 0), (0, 0), (P, P), (0, 0)))
    xflat = xflat.reshape(N, Cin, flat_len)
    xflat = jnp.pad(xflat, ((0, 0), (0, 0), (P, padlen - flat_len - P)))
    xflat = xflat.astype(jnp.float32)
    # TODO(synk): bf16 streaming of xflat would halve HBM bytes of the dominant
    # operand, but breaks f32 parity with the torch module at the 2e-4
    # tolerance; kept f32 for exact forward semantics.

    kernel = functools.partial(_conv_taps_kernel, k=k, W=W, HW=HW, P=P)
    out = pl.pallas_call(
        kernel,
        out_shape=jax.ShapeDtypeStruct((N, Cout, HW), jnp.float32),
        grid=(N,),
        in_specs=[
            pl.BlockSpec((k * k, Cout, Cin), lambda n: (0, 0, 0)),
            pl.BlockSpec((Cout, 1), lambda n: (0, 0)),
            pl.BlockSpec((None, Cin, padlen), lambda n: (n, 0, 0)),
        ],
        out_specs=pl.BlockSpec((None, Cout, HW), lambda n: (n, 0, 0)),
        compiler_params=pltpu.CompilerParams(
            dimension_semantics=("parallel",)),
    )(w_taps, bias, xflat)
    # TODO(synk): for very large H*W add spatial row-block tiling with a halo
    # (manual DMA, overlapping windows); whole-image blocks are fine here.

    # batch-major kernel output -> NCHW is a free reshape (no transpose pass)
    return out.reshape(N, Cout, H, W)


class FastfoodWrapConv:
    """FastfoodWrap around a Conv2d(in_ch, out_ch, k, padding=k//2) (said=False)."""

    def __init__(self, key, intrinsic_dimension, in_ch=4, out_ch=4, k=3):
        keys = jax.random.split(key, 5)
        fan_in = in_ch * k * k
        bound = 1.0 / float(np.sqrt(fan_in))
        self.in_ch, self.out_ch, self.k = in_ch, out_ch, k
        # frozen initial values of the wrapped module's parameters
        self.w0 = jax.random.uniform(keys[0], (out_ch, in_ch, k, k),
                                     jnp.float32, -bound, bound)
        self.b0 = jax.random.uniform(keys[1], (out_ch,), jnp.float32, -bound, bound)
        # intrinsic parameter (zeros in the torch __init__; random here so the
        # Fastfood path is exercised with non-trivial values — deterministic)
        self.theta = jax.random.normal(keys[2], (intrinsic_dimension,), jnp.float32)
        # raw fastfood vars (kept for the pure-JAX reference check)
        self.tracked = {
            "weight": (self.w0, fastfood_vars_jax(out_ch * in_ch * k * k, keys[3])),
            "bias": (self.b0, fastfood_vars_jax(out_ch, keys[4])),
        }

        # ---- init-time precompute: collapse B·H·Pi·G·H, divisor, output scale
        # and the (kh,kw,o,ci) layout permutation into one dense map M_all; the
        # hot path is just theta @ M_all (done in the jitted wrapper).
        dd = intrinsic_dimension
        DD_w = out_ch * in_ch * k * k
        Mw = _fastfood_dense_map(dd, DD_w, *self.tracked["weight"][1])  # OIHW cols
        Mb = _fastfood_dense_map(dd, out_ch, *self.tracked["bias"][1])
        perm = np.transpose(np.arange(DD_w).reshape(out_ch, in_ch, k, k),
                            (2, 3, 0, 1)).reshape(-1)       # (kh,kw,o,ci) -> OIHW idx
        m_all = np.concatenate([Mw[:, perm], Mb], axis=1)    # (dd, DD_w + Cout)
        v0_all = np.concatenate(
            [np.transpose(np.asarray(self.w0), (2, 3, 0, 1)).reshape(-1),
             np.asarray(self.b0)])

        self.m_all = jnp.asarray(m_all, jnp.float32)          # frozen
        self.v0_all = jnp.asarray(v0_all, jnp.float32)        # frozen
        self.theta2d = self.theta.reshape(1, dd)

    def forward(self, x_nchw):
        return _forward(self.theta2d, self.m_all, self.v0_all, x_nchw, self.k)


# ----------------------------------------------------------------------------
# Pure-JAX reference (correctness check only — mirrors the torch module)
# ----------------------------------------------------------------------------

def _fwht_ref(x):
    n = x.shape[0]
    k = int(round(np.log2(n)))
    y = x.reshape([2] * k) if k > 0 else x
    for d in range(k):
        a, b = jnp.split(y, 2, axis=d)
        y = jnp.concatenate([a + b, a - b], axis=d)
    return y.reshape(n)


def _fastfood_ref(v, DD, BB, Pi, GG, divisor, LL):
    n = min(int(v.shape[0]), LL)
    vp = jnp.zeros(LL, jnp.float32).at[:n].set(v[:n])
    m5 = _fwht_ref(GG * _fwht_ref(BB * vp)[Pi])
    return m5[:DD] / (divisor * float(np.sqrt(float(DD) / float(LL))))


def _forward_ref(model, x):
    params = {}
    for name, (v0, (BB, Pi, GG, divisor, LL)) in model.tracked.items():
        DD = int(np.prod(v0.shape))
        params[name] = v0 + _fastfood_ref(model.theta, DD, BB, Pi, GG, divisor, LL
                                          ).reshape(v0.shape)
    y = lax.conv_general_dilated(x, params["weight"], (1, 1), "SAME",
                                 dimension_numbers=("NCHW", "OIHW", "NCHW"))
    return y + params["bias"][None, :, None, None]


# ----------------------------------------------------------------------------

if __name__ == "__main__":
    key = jax.random.PRNGKey(0)
    k_model, k_x = jax.random.split(key)

    intrinsic_dimension = 10
    model = FastfoodWrapConv(k_model, intrinsic_dimension, in_ch=4, out_ch=4, k=3)

    x = jax.random.normal(k_x, (2, 4, 16, 16), jnp.float32)   # NCHW, like PyTorch

    y = model.forward(x)
    y = jax.block_until_ready(y)

    y_ref = jax.block_until_ready(_forward_ref(model, x))
    assert y.shape == (2, 4, 16, 16)
    np.testing.assert_allclose(np.asarray(y), np.asarray(y_ref), rtol=2e-4, atol=2e-4)

    print("KERNEL_OK")
</pallas_src>

<mosaic_0001>
module attributes {stable_mosaic.version = 11 : i64} {
  func.func @_conv_taps_kernel(%arg0: i32, %arg1: memref<9x4x4xf32, #tpu.memory_space<vmem>>, %arg2: memref<4x1xf32, #tpu.memory_space<vmem>>, %arg3: memref<1x4x384xf32, #tpu.memory_space<vmem>>, %arg4: memref<1x4x256xf32, #tpu.memory_space<vmem>>) attributes {dimension_semantics = [#tpu.dimension_semantics<parallel>], iteration_bounds = array<i64: 2>, scalar_prefetch = 0 : i64, scratch_operands = 0 : i64, tpu.core_type = #tpu.core_type<tc>, window_params = [{pipeline_mode = #tpu.pipeline_mode<synchronous>, transform_indices = @transform_0, window_bounds = array<i64: 9, 4, 4>}, {pipeline_mode = #tpu.pipeline_mode<synchronous>, transform_indices = @transform_1, window_bounds = array<i64: 4, 1>}, {transform_indices = @transform_2, window_bounds = array<i64: 1, 4, 384>}, {transform_indices = @transform_3, window_bounds = array<i64: 1, 4, 256>}]} {
    %0 = tpu.iota {dimensions = array<i32: 1>} : vector<1x256xi32>
    %c16_i32 = arith.constant 16 : i32
    %c0_i32 = arith.constant 0 : i32
    %1 = arith.cmpi eq, %c16_i32, %c0_i32 : i32
    %c1_i32 = arith.constant 1 : i32
    %2 = arith.select %1, %c1_i32, %c16_i32 : i32
    %3 = vector.broadcast %2 : i32 to vector<1x256xi32>
    %4 = arith.remsi %0, %3 : vector<1x256xi32>
    %c0_i32_0 = arith.constant 0 : i32
    %5 = vector.broadcast %c0_i32_0 : i32 to vector<1x256xi32>
    %6 = arith.cmpi ne, %4, %5 : vector<1x256xi32>
    %c0_i32_1 = arith.constant 0 : i32
    %7 = vector.broadcast %c0_i32_1 : i32 to vector<1x256xi32>
    %8 = arith.cmpi slt, %4, %7 : vector<1x256xi32>
    %c0_i32_2 = arith.constant 0 : i32
    %9 = arith.cmpi slt, %2, %c0_i32_2 : i32
    %10 = vector.broadcast %9 : i1 to vector<1x256xi1>
    %11 = vector.broadcast %10 : vector<1x256xi1> to vector<1x256xi1>
    %12 = arith.xori %8, %11 : vector<1x256xi1>
    %13 = arith.andi %12, %6 : vector<1x256xi1>
    %14 = vector.broadcast %2 : i32 to vector<1x256xi32>
    %15 = arith.addi %4, %14 : vector<1x256xi32>
    %16 = arith.select %13, %15, %4 : vector<1x256xi1>, vector<1x256xi32>
    %cst = arith.constant 0.000000e+00 : f32
    %17 = vector.broadcast %cst : f32 to vector<4x256xf32>
    %cst_3 = arith.constant 0.000000e+00 : f32
    %18 = vector.broadcast %cst_3 : f32 to vector<4x256xf32>
    %c0 = arith.constant 0 : index
    %c0_4 = arith.constant 0 : index
    %c0_5 = arith.constant 0 : index
    %19 = vector.load %arg3[%c0, %c0_4, %c0_5] : memref<1x4x384xf32, #tpu.memory_space<vmem>>, vector<1x4x256xf32>
    %20 = vector.shape_cast %19 : vector<1x4x256xf32> to vector<4x256xf32>
    %c0_6 = arith.constant 0 : index
    %c0_7 = arith.constant 0 : index
    %c0_8 = arith.constant 0 : index
    %21 = vector.load %arg1[%c0_6, %c0_7, %c0_8] : memref<9x4x4xf32, #tpu.memory_space<vmem>>, vector<1x4x4xf32>
    %22 = vector.shape_cast %21 : vector<1x4x4xf32> to vector<4x4xf32>
    %cst_9 = arith.constant dense<0.000000e+00> : vector<4x256xf32>
    %23 = tpu.matmul %22, %20, %cst_9 {dimension_numbers = #tpu.dot_dimension_numbers<[1], [0], [0], [1], [0, 0, 1, 1], [], []>} : vector<4x4xf32>, vector<4x256xf32>, vector<4x256xf32> -> vector<4x256xf32>
    %24 = arith.addf %18, %23 : vector<4x256xf32>
    %c0_10 = arith.constant 0 : index
    %c0_11 = arith.constant 0 : index
    %c16 = arith.constant 16 : index
    %25 = vector.load %arg3[%c0_10, %c0_11, %c16] : memref<1x4x384xf32, #tpu.memory_space<vmem>>, vector<1x4x256xf32>
    %26 = vector.shape_cast %25 : vector<1x4x256xf32> to vector<4x256xf32>
    %c3 = arith.constant 3 : index
    %c0_12 = arith.constant 0 : index
    %c0_13 = arith.constant 0 : index
    %27 = vector.load %arg1[%c3, %c0_12, %c0_13] : memref<9x4x4xf32, #tpu.memory_space<vmem>>, vector<1x4x4xf32>
    %28 = vector.shape_cast %27 : vector<1x4x4xf32> to vector<4x4xf32>
    %cst_14 = arith.constant dense<0.000000e+00> : vector<4x256xf32>
    %29 = tpu.matmul %28, %26, %cst_14 {dimension_numbers = #tpu.dot_dimension_numbers<[1], [0], [0], [1], [0, 0, 1, 1], [], []>} : vector<4x4xf32>, vector<4x256xf32>, vector<4x256xf32> -> vector<4x256xf32>
    %30 = arith.addf %24, %29 : vector<4x256xf32>
    %c0_15 = arith.constant 0 : index
    %c0_16 = arith.constant 0 : index
    %c32 = arith.constant 32 : index
    %31 = vector.load %arg3[%c0_15, %c0_16, %c32] : memref<1x4x384xf32, #tpu.memory_space<vmem>>, vector<1x4x256xf32>
    %32 = vector.shape_cast %31 : vector<1x4x256xf32> to vector<4x256xf32>
    %c6 = arith.constant 6 : index
    %c0_17 = arith.constant 0 : index
    %c0_18 = arith.constant 0 : index
    %33 = vector.load %arg1[%c6, %c0_17, %c0_18] : memref<9x4x4xf32, #tpu.memory_space<vmem>>, vector<1x4x4xf32>
    %34 = vector.shape_cast %33 : vector<1x4x4xf32> to vector<4x4xf32>
    %cst_19 = arith.constant dense<0.000000e+00> : vector<4x256xf32>
    %35 = tpu.matmul %34, %32, %cst_19 {dimension_numbers = #tpu.dot_dimension_numbers<[1], [0], [0], [1], [0, 0, 1, 1], [], []>} : vector<4x4xf32>, vector<4x256xf32>, vector<4x256xf32> -> vector<4x256xf32>
    %36 = arith.addf %30, %35 : vector<4x256xf32>
    %c1_i32_20 = arith.constant 1 : i32
    %37 = vector.broadcast %c1_i32_20 : i32 to vector<1x256xi32>
    %38 = arith.cmpi slt, %16, %37 : vector<1x256xi32>
    %cst_21 = arith.constant 0.000000e+00 : f32
    %39 = vector.shape_cast %38 : vector<1x256xi1> to vector<1x256xi1>
    %40 = vector.broadcast %39 : vector<1x256xi1> to vector<4x256xi1>
    %41 = vector.broadcast %cst_21 : f32 to vector<4x256xf32>
    %42 = arith.select %40, %41, %36 : vector<4x256xi1>, vector<4x256xf32>
    %43 = arith.addf %17, %42 : vector<4x256xf32>
    %cst_22 = arith.constant 0.000000e+00 : f32
    %44 = vector.broadcast %cst_22 : f32 to vector<4x256xf32>
    %c0_23 = arith.constant 0 : index
    %c0_24 = arith.constant 0 : index
    %c1 = arith.constant 1 : index
    %45 = vector.load %arg3[%c0_23, %c0_24, %c1] : memref<1x4x384xf32, #tpu.memory_space<vmem>>, vector<1x4x256xf32>
    %46 = vector.shape_cast %45 : vector<1x4x256xf32> to vector<4x256xf32>
    %c1_25 = arith.constant 1 : index
    %c0_26 = arith.constant 0 : index
    %c0_27 = arith.constant 0 : index
    %47 = vector.load %arg1[%c1_25, %c0_26, %c0_27] : memref<9x4x4xf32, #tpu.memory_space<vmem>>, vector<1x4x4xf32>
    %48 = vector.shape_cast %47 : vector<1x4x4xf32> to vector<4x4xf32>
    %cst_28 = arith.constant dense<0.000000e+00> : vector<4x256xf32>
    %49 = tpu.matmul %48, %46, %cst_28 {dimension_numbers = #tpu.dot_dimension_numbers<[1], [0], [0], [1], [0, 0, 1, 1], [], []>} : vector<4x4xf32>, vector<4x256xf32>, vector<4x256xf32> -> vector<4x256xf32>
    %50 = arith.addf %44, %49 : vector<4x256xf32>
    %c0_29 = arith.constant 0 : index
    %c0_30 = arith.constant 0 : index
    %c17 = arith.constant 17 : index
    %51 = vector.load %arg3[%c0_29, %c0_30, %c17] : memref<1x4x384xf32, #tpu.memory_space<vmem>>, vector<1x4x256xf32>
    %52 = vector.shape_cast %51 : vector<1x4x256xf32> to vector<4x256xf32>
    %c4 = arith.constant 4 : index
    %c0_31 = arith.constant 0 : index
    %c0_32 = arith.constant 0 : index
    %53 = vector.load %arg1[%c4, %c0_31, %c0_32] : memref<9x4x4xf32, #tpu.memory_space<vmem>>, vector<1x4x4xf32>
    %54 = vector.shape_cast %53 : vector<1x4x4xf32> to vector<4x4xf32>
    %cst_33 = arith.constant dense<0.000000e+00> : vector<4x256xf32>
    %55 = tpu.matmul %54, %52, %cst_33 {dimension_numbers = #tpu.dot_dimension_numbers<[1], [0], [0], [1], [0, 0, 1, 1], [], []>} : vector<4x4xf32>, vector<4x256xf32>, vector<4x256xf32> -> vector<4x256xf32>
    %56 = arith.addf %50, %55 : vector<4x256xf32>
    %c0_34 = arith.constant 0 : index
    %c0_35 = arith.constant 0 : index
    %c33 = arith.constant 33 : index
    %57 = vector.load %arg3[%c0_34, %c0_35, %c33] : memref<1x4x384xf32, #tpu.memory_space<vmem>>, vector<1x4x256xf32>
    %58 = vector.shape_cast %57 : vector<1x4x256xf32> to vector<4x256xf32>
    %c7 = arith.constant 7 : index
    %c0_36 = arith.constant 0 : index
    %c0_37 = arith.constant 0 : index
    %59 = vector.load %arg1[%c7, %c0_36, %c0_37] : memref<9x4x4xf32, #tpu.memory_space<vmem>>, vector<1x4x4xf32>
    %60 = vector.shape_cast %59 : vector<1x4x4xf32> to vector<4x4xf32>
    %cst_38 = arith.constant dense<0.000000e+00> : vector<4x256xf32>
    %61 = tpu.matmul %60, %58, %cst_38 {dimension_numbers = #tpu.dot_dimension_numbers<[1], [0], [0], [1], [0, 0, 1, 1], [], []>} : vector<4x4xf32>, vector<4x256xf32>, vector<4x256xf32> -> vector<4x256xf32>
    %62 = arith.addf %56, %61 : vector<4x256xf32>
    %63 = arith.addf %43, %62 : vector<4x256xf32>
    %cst_39 = arith.constant 0.000000e+00 : f32
    %64 = vector.broadcast %cst_39 : f32 to vector<4x256xf32>
    %c0_40 = arith.constant 0 : index
    %c0_41 = arith.constant 0 : index
    %c2 = arith.constant 2 : index
    %65 = vector.load %arg3[%c0_40, %c0_41, %c2] : memref<1x4x384xf32, #tpu.memory_space<vmem>>, vector<1x4x256xf32>
    %66 = vector.shape_cast %65 : vector<1x4x256xf32> to vector<4x256xf32>
    %c2_42 = arith.constant 2 : index
    %c0_43 = arith.constant 0 : index
    %c0_44 = arith.constant 0 : index
    %67 = vector.load %arg1[%c2_42, %c0_43, %c0_44] : memref<9x4x4xf32, #tpu.memory_space<vmem>>, vector<1x4x4xf32>
    %68 = vector.shape_cast %67 : vector<1x4x4xf32> to vector<4x4xf32>
    %cst_45 = arith.constant dense<0.000000e+00> : vector<4x256xf32>
    %69 = tpu.matmul %68, %66, %cst_45 {dimension_numbers = #tpu.dot_dimension_numbers<[1], [0], [0], [1], [0, 0, 1, 1], [], []>} : vector<4x4xf32>, vector<4x256xf32>, vector<4x256xf32> -> vector<4x256xf32>
    %70 = arith.addf %64, %69 : vector<4x256xf32>
    %c0_46 = arith.constant 0 : index
    %c0_47 = arith.constant 0 : index
    %c18 = arith.constant 18 : index
    %71 = vector.load %arg3[%c0_46, %c0_47, %c18] : memref<1x4x384xf32, #tpu.memory_space<vmem>>, vector<1x4x256xf32>
    %72 = vector.shape_cast %71 : vector<1x4x256xf32> to vector<4x256xf32>
    %c5 = arith.constant 5 : index
    %c0_48 = arith.constant 0 : index
    %c0_49 = arith.constant 0 : index
    %73 = vector.load %arg1[%c5, %c0_48, %c0_49] : memref<9x4x4xf32, #tpu.memory_space<vmem>>, vector<1x4x4xf32>
    %74 = vector.shape_cast %73 : vector<1x4x4xf32> to vector<4x4xf32>
    %cst_50 = arith.constant dense<0.000000e+00> : vector<4x256xf32>
    %75 = tpu.matmul %74, %72, %cst_50 {dimension_numbers = #tpu.dot_dimension_numbers<[1], [0], [0], [1], [0, 0, 1, 1], [], []>} : vector<4x4xf32>, vector<4x256xf32>, vector<4x256xf32> -> vector<4x256xf32>
    %76 = arith.addf %70, %75 : vector<4x256xf32>
    %c0_51 = arith.constant 0 : index
    %c0_52 = arith.constant 0 : index
    %c34 = arith.constant 34 : index
    %77 = vector.load %arg3[%c0_51, %c0_52, %c34] : memref<1x4x384xf32, #tpu.memory_space<vmem>>, vector<1x4x256xf32>
    %78 = vector.shape_cast %77 : vector<1x4x256xf32> to vector<4x256xf32>
    %c8 = arith.constant 8 : index
    %c0_53 = arith.constant 0 : index
    %c0_54 = arith.constant 0 : index
    %79 = vector.load %arg1[%c8, %c0_53, %c0_54] : memref<9x4x4xf32, #tpu.memory_space<vmem>>, vector<1x4x4xf32>
    %80 = vector.shape_cast %79 : vector<1x4x4xf32> to vector<4x4xf32>
    %cst_55 = arith.constant dense<0.000000e+00> : vector<4x256xf32>
    %81 = tpu.matmul %80, %78, %cst_55 {dimension_numbers = #tpu.dot_dimension_numbers<[1], [0], [0], [1], [0, 0, 1, 1], [], []>} : vector<4x4xf32>, vector<4x256xf32>, vector<4x256xf32> -> vector<4x256xf32>
    %82 = arith.addf %76, %81 : vector<4x256xf32>
    %c15_i32 = arith.constant 15 : i32
    %83 = vector.broadcast %c15_i32 : i32 to vector<1x256xi32>
    %84 = arith.cmpi sge, %16, %83 : vector<1x256xi32>
    %cst_56 = arith.constant 0.000000e+00 : f32
    %85 = vector.shape_cast %84 : vector<1x256xi1> to vector<1x256xi1>
    %86 = vector.broadcast %85 : vector<1x256xi1> to vector<4x256xi1>
    %87 = vector.broadcast %cst_56 : f32 to vector<4x256xf32>
    %88 = arith.select %86, %87, %82 : vector<4x256xi1>, vector<4x256xf32>
    %89 = arith.addf %63, %88 : vector<4x256xf32>
    %c0_57 = arith.constant 0 : index
    %c0_58 = arith.constant 0 : index
    %90 = vector.load %arg2[%c0_57, %c0_58] : memref<4x1xf32, #tpu.memory_space<vmem>>, vector<4x1xf32>
    %91 = vector.broadcast %90 : vector<4x1xf32> to vector<4x256xf32>
    %92 = arith.addf %89, %91 : vector<4x256xf32>
    %c0_59 = arith.constant 0 : index
    %c0_60 = arith.constant 0 : index
    %c0_61 = arith.constant 0 : index
    %93 = vector.load %arg4[%c0_59, %c0_60, %c0_61] : memref<1x4x256xf32, #tpu.memory_space<vmem>>, vector<1x4x256xf32>
    %94 = vector.shape_cast %93 : vector<1x4x256xf32> to vector<4x256xf32>
    %95 = vector.shape_cast %92 : vector<4x256xf32> to vector<1x4x256xf32>
    tpu.vector_store %arg4[%c0_59, %c0_60, %c0_61], %95 {strides = array<i32>} : memref<1x4x256xf32, #tpu.memory_space<vmem>>, vector<1x4x256xf32>,
    return
  }
  func.func @transform_0(%arg0: i32) -> (i32, i32, i32) {
    %c0_i32 = arith.constant 0 : i32
    %c0_i32_0 = arith.constant 0 : i32
    %c0_i32_1 = arith.constant 0 : i32
    %c0_i32_2 = arith.constant 0 : i32
    return %c0_i32, %c0_i32_0, %c0_i32_1 : i32, i32, i32
  }
  func.func @transform_1(%arg0: i32) -> (i32, i32) {
    %c0_i32 = arith.constant 0 : i32
    %c0_i32_0 = arith.constant 0 : i32
    %c0_i32_1 = arith.constant 0 : i32
    return %c0_i32, %c0_i32_0 : i32, i32
  }
  func.func @transform_2(%arg0: i32) -> (i32, i32, i32) {
    %c0_i32 = arith.constant 0 : i32
    %c0_i32_0 = arith.constant 0 : i32
    %c0_i32_1 = arith.constant 0 : i32
    return %arg0, %c0_i32, %c0_i32_0 : i32, i32, i32
  }
  func.func @transform_3(%arg0: i32) -> (i32, i32, i32) {
    %c0_i32 = arith.constant 0 : i32
    %c0_i32_0 = arith.constant 0 : i32
    %c0_i32_1 = arith.constant 0 : i32
    return %arg0, %c0_i32, %c0_i32_0 : i32, i32, i32
  }
}

</mosaic_0001>

<bundles_post_ra>
// kernel: _forward.1
= control target key start
LH: loop header
LB: loop body
LE: loop exit
PB: predicated region body
PF: predicated region fallthrough
CT: control target
= control target key end

     0   :  { %s997_s12 = smov 0   ;;  %s1119_s0 = inlined_call_operand.vmem [shape: f32[9,4,4], index: 0, kind: input, shape index: {}]   ;;  %s1120_s1 = inlined_call_operand.vmem [shape: f32[4,1], index: 1, kind: input, shape index: {}]   ;;  %s1121_s2 = inlined_call_operand.vmem [shape: f32[2,4,384], index: 2, kind: input, shape index: {}]   ;;  %s1122_s3 = inlined_call_operand.vmem [shape: f32[2,4,256], index: 3, kind: output, shape index: {}]  }
   0x1 LB: > { %s886_s13 = sadd.s32 4294967295, %s966_s12   ;;  %p890_p0 = scmp.ge.s32.totalorder %s966_s12, 1  ;;  %s966_s12 = sphi %s997_s12, %s13_s12  }
   0x2   : > { %p137_p1 = scmp.lt.s32.totalorder %s966_s12, 3 }
   0x4   : > { %p138_p2 = pnand %p890_p0, %p137_p1 }
   0x5   : > { %p161_p3 = scmp.lt.s32.totalorder (!%p138_p2), %s886_s13, 1  ;;  %s968_s18 = smov (!%p138_p2), 112  }
   0x6   : > { %141 = sbr.rel (%p138_p2) target bundleno = 342 (0x156), region = 32  ;;  %s969_s19 = smov (!%p138_p2), 96  }
   0x7   : > { %s970_s20 = smov (!%p138_p2), 111   ;;  %s971_s21 = smov (!%p138_p2), 127  }
   0x8   : > { %s972_s22 = smov (!%p138_p2), 95   ;;  %s973_s23 = smov (!%p138_p2), 110  }
   0x9   : > { %s974_s24 = smov (!%p138_p2), 126   ;;  %s975_s25 = smov (!%p138_p2), 94  }
   0xb   : > { %s1124_s13 = smov (!%p161_p3, %s886_s13), 1  ;;  %vm225_vm0 = vcmask 1043456   ;;  %v199_v33 = vld [vmem:[%s1119_s0] sm:$0xf]  ;;  %vm221_vm1 = vcmask 31744   ;;  %vm218_vm2 = vcmask 916480  }
   0xc   : > { %s941_s14 = smul.u32 12, %s1124_s13  ;;  %v894_v37 = vld [vmem:[%s1119_s0 + $0xc] sm:$0xf]  ;;  %vm421_vm3 = vcmask 908288   ;;  %v909_v43 = vld [vmem:[%s1119_s0 + $0x10] sm:$0xf] }
   0xd   : > { %vm339_vm4 = vcmask 785408   ;;  %v903_v50 = vld [vmem:[%s1119_s0 + $0x18] sm:$0xf]  ;;  %vm551_vm5 = vcmask 777216   ;;  %v918_v54 = vld [vmem:[%s1119_s0 + $0x1c] sm:$0xf] }
   0xe   : > { %s1011_s17 = scalar_lea.vmem %s1121_s2, %s941_s14  ;;  %vm483_vm6 = vcmask 1039360   ;;  %v908_v60 = vld [vmem:[%s1119_s0 + $0x4] sm:$0xf]  ;;  %v817_v61 = vld [vmem:[%s1120_s1] sm:$0xf]  ;;  %v976_v62 = vmov 0  }
   0xf   : > { %v1014_v0 = vld [vmem:[%s1011_s17] sm:$0xff]  ;;  %v201_v1 = vld [vmem:[%s1011_s17 + $0x8] sm:$0xf]  ;;  %959 = vset.pattern.permute.xlu0 %v976_v62  ;;  %vm687_vm7 = vcmask 1031168   ;;  %vm625_vm8 = vcmask 900096   ;;  %vm755_vm9 = vcmask 769024  }
  0x10   : > { %206 = vst [vmem:[#allocation1] ss:$2 sm:$0xff] %v1014_v0  ;;  %v322_v2 = vld [vmem:[%s1011_s17 + $0x8] sm:$0xf] }
  0x11   : > { %208 = vst [vmem:[#allocation1 + $0x10] ss:$2 sm:$0xff] %v201_v1  ;;  %v402_v6 = vld [vmem:[%s1011_s17 + $0x8] sm:$0xf] }
  0x12   : > { %v534_v13 = vld [vmem:[%s1011_s17 + $0x8] sm:$0xf] }
  0x13   : > { %v606_v17 = vld [vmem:[%s1011_s17 + $0x8] sm:$0xf] }
  0x14   : > { %v738_v24 = vld [vmem:[%s1011_s17 + $0x8] sm:$0xf] }
  0x17   : > { %v210_v3 = vld.sshfl [vmem:[#allocation1 + $0x8] sm:$0xff pattern:$0x75316420]  ;;  %v209_v4 = vld.sshfl [vmem:[#allocation1] sm:$0xff pattern:$0x75316420] }
  0x18   : > { %214 = vrot.lane.b32.xlu0 %v210_v3, %s968_s18  ;;  %v211_v5 = vld.sshfl [vmem:[#allocation1 + $0x10] sm:$0xff pattern:$0x75316420]  ;;  %212 = vrot.lane.b32.xlu1 %v209_v4, %s968_s18  ;;  %271 = vst [vmem:[#allocation1] ss:$2 sm:$0xff] %v1014_v0 }
  0x19   : > { %329 = vst [vmem:[#allocation1 + $0x10] ss:$2 sm:$0xff] %v322_v2 }
  0x1f   : > { %v1021_v7 = vld.sshfl [vmem:[#allocation1] sm:$0xff pattern:$0x75316420]  ;;  %v1023_v8 = vld.sshfl [vmem:[#allocation1 + $0x8] sm:$0xff pattern:$0x75316420] }
  0x20   : > { %216 = vrot.lane.b32.xlu0 %v211_v5, %s968_s18  ;;  %327 = vst [vmem:[#allocation1] ss:$2 sm:$0xff] %v1014_v0  ;;  %v332_v9 = vld.sshfl [vmem:[#allocation1 + $0x10] sm:$0xff pattern:$0x75316420]  ;;  %899 = vmatpush.msk.msra.mxu2 %vm225_vm0, %v1021_v7 }
  0x21   : > { %411 = vst [vmem:[#allocation1 + $0x10] ss:$2 sm:$0xff] %v402_v6  ;;  %337 = vrot.lane.b32.xlu2 %v332_v9, %s969_s19  ;;  %901 = vmatpush.msk.msra.mxu3 %vm225_vm0, %v1023_v8  ;;  %v923_v5 = vld [vmem:[%s1119_s0 + $0x8] sm:$0xf]  ;;  %v924_v8 = vld [vmem:[%s1119_s0 + $0x14] sm:$0xf] }
  0x22   : > { %900 = vmatmul.msk.f32.vlgmr.msra.gmra.mxu2 %vm221_vm1, %v199_v33  ;;  %902 = vmatmul.msk.f32.vlgmr.msra.gmra.mxu3 %vm221_vm1, %v199_v33 }
  0x27   : > { %v331_v10 = vld.sshfl [vmem:[#allocation1 + $0x8] sm:$0xff pattern:$0x75316420]  ;;  %v330_v11 = vld.sshfl [vmem:[#allocation1] sm:$0xff pattern:$0x75316420] }
  0x28   : > { %335 = vrot.lane.b32.xlu1 %v331_v10, %s969_s19  ;;  %v414_v12 = vld.sshfl [vmem:[#allocation1 + $0x10] sm:$0xff pattern:$0x75316420]  ;;  %409 = vst [vmem:[#allocation1] ss:$2 sm:$0xff] %v1014_v0 }
  0x29   : > { %473 = vst [vmem:[#allocation1 + $0x10] ss:$2 sm:$0xff] %v402_v6  ;;  %419 = vrot.lane.b32.xlu0 %v414_v12, %s970_s20 }
  0x2f   : > { %v412_v14 = vld.sshfl [vmem:[#allocation1] sm:$0xff pattern:$0x75316420]  ;;  %v413_v15 = vld.sshfl [vmem:[#allocation1 + $0x8] sm:$0xff pattern:$0x75316420] }
  0x30   : > { %333 = vrot.lane.b32.xlu1 %v330_v11, %s969_s19  ;;  %471 = vst [vmem:[#allocation1] ss:$2 sm:$0xff] %v1014_v0  ;;  %v476_v16 = vld.sshfl [vmem:[#allocation1 + $0x10] sm:$0xff pattern:$0x75316420]  ;;  %417 = vrot.lane.b32.xlu2 %v413_v15, %s970_s20 }
  0x31   : > { %541 = vst [vmem:[#allocation1 + $0x10] ss:$2 sm:$0xff] %v534_v13 }
  0x37   : > { %v475_v18 = vld.sshfl [vmem:[#allocation1 + $0x8] sm:$0xff pattern:$0x75316420]  ;;  %v474_v19 = vld.sshfl [vmem:[#allocation1] sm:$0xff pattern:$0x75316420] }
  0x38   : > { %481 = vrot.lane.b32.xlu1 %v476_v16, %s971_s21  ;;  %479 = vrot.lane.b32.xlu0 %v475_v18, %s971_s21  ;;  %v544_v20 = vld.sshfl [vmem:[#allocation1 + $0x10] sm:$0xff pattern:$0x75316420]  ;;  %539 = vst [vmem:[#allocation1] ss:$2 sm:$0xff] %v1014_v0 }
  0x39   : > { %615 = vst [vmem:[#allocation1 + $0x10] ss:$2 sm:$0xff] %v606_v17  ;;  %415 = vrot.lane.b32.xlu2 %v412_v14, %s970_s20 }
  0x3f   : > { %v542_v21 = vld.sshfl [vmem:[#allocation1] sm:$0xff pattern:$0x75316420]  ;;  %v543_v22 = vld.sshfl [vmem:[#allocation1 + $0x8] sm:$0xff pattern:$0x75316420] }
  0x40   : > { %549 = vrot.lane.b32.xlu0 %v544_v20, %s972_s22  ;;  %477 = vrot.lane.b32.xlu1 %v474_v19, %s971_s21  ;;  %v618_v23 = vld.sshfl [vmem:[#allocation1 + $0x10] sm:$0xff pattern:$0x75316420]  ;;  %613 = vst [vmem:[#allocation1] ss:$2 sm:$0xff] %v1014_v0  ;;  %s940_s21 = sshll.u32 %s1124_s13, 3 }
  0x41   : > { %677 = vst [vmem:[#allocation1 + $0x10] ss:$2 sm:$0xff] %v606_v17  ;;  %547 = vrot.lane.b32.xlu2 %v543_v22, %s972_s22  ;;  %v933_v17 = vld [vmem:[%s1119_s0 + $0x20] sm:$0xf] }
  0x47   : > { %v617_v25 = vld.sshfl [vmem:[#allocation1 + $0x8] sm:$0xff pattern:$0x75316420]  ;;  %v616_v26 = vld.sshfl [vmem:[#allocation1] sm:$0xff pattern:$0x75316420] }
  0x48   : > { %623 = vrot.lane.b32.xlu1 %v618_v23, %s973_s23  ;;  %621 = vrot.lane.b32.xlu0 %v617_v25, %s973_s23  ;;  %v680_v27 = vld.sshfl [vmem:[#allocation1 + $0x10] sm:$0xff pattern:$0x75316420]  ;;  %675 = vst [vmem:[#allocation1] ss:$2 sm:$0xff] %v1014_v0 }
  0x49   : > { %745 = vst [vmem:[#allocation1 + $0x10] ss:$2 sm:$0xff] %v738_v24  ;;  %545 = vrot.lane.b32.xlu2 %v542_v21, %s972_s22 }
  0x4f   : > { %v678_v28 = vld.sshfl [vmem:[#allocation1] sm:$0xff pattern:$0x75316420]  ;;  %v679_v29 = vld.sshfl [vmem:[#allocation1 + $0x8] sm:$0xff pattern:$0x75316420] }
  0x50   : > { %685 = vrot.lane.b32.xlu0 %v680_v27, %s974_s24  ;;  %619 = vrot.lane.b32.xlu1 %v616_v26, %s973_s23  ;;  %743 = vst [vmem:[#allocation1] ss:$2 sm:$0xff] %v1014_v0  ;;  %v748_v30 = vld.sshfl [vmem:[#allocation1 + $0x10] sm:$0xff pattern:$0x75316420] }
  0x51   : > { %683 = vrot.lane.b32.xlu2 %v679_v29, %s974_s24 }
  0x57   : > { %v747_v31 = vld.sshfl [vmem:[#allocation1 + $0x8] sm:$0xff pattern:$0x75316420]  ;;  %v746_v32 = vld.sshfl [vmem:[#allocation1] sm:$0xff pattern:$0x75316420] }
  0x58   : > { %753 = vrot.lane.b32.xlu1 %v748_v30, %s975_s25  ;;  %751 = vrot.lane.b32.xlu0 %v747_v31, %s975_s25 }
  0x59   : > { %681 = vrot.lane.b32.xlu2 %v678_v28, %s974_s24  ;;  %v171_v28 = vlaneseq  ;;  %s170_s24 = scalar_lea.vmem %s1122_s3, %s940_s21 }
  0x5b   : > { %v172_v31 = vand.u32 127, %v171_v28 }
  0x5d   : > { %v173_v33 = vadd.s32 128, %v172_v31 }
  0x60   : > { %820 = vperm.xlu0 %959, %v817_v61  }
  0x61   : > { %749 = vrot.lane.b32.xlu2 %v746_v32, %s975_s25 }
  0x7b   : > { %v338_v34 = vpop.permute.xlu2 %337 }
  0x8a   : > { %v215_v35 = vpop.permute.xlu0 %214  ;;  %v213_v36 = vpop.permute.xlu1 %212 }
  0x8b   : > { %v219_v38 = vsel %vm218_vm2, %v213_v36, %v215_v35  ;;  %v418_v39 = vpop.permute.xlu2 %417 }
  0x8c   : > { %895 = vmatpush.msk.msra.mxu0 %vm225_vm0, %v219_v38 }
  0x8d   : > { %896 = vmatmul.msk.f32.vlgmr.msra.gmra.mxu0 %vm221_vm1, %v894_v37 }
  0x92   : > { %v217_v40 = vpop.permute.xlu0 %216 }
  0x93   : > { %v220_v41 = vsel %vm218_vm2, %v215_v35, %v217_v40  ;;  %v416_v42 = vpop.permute.xlu2 %415  ;;  %v185_v40 = vand.u32 15, %v173_v33 }
  0x94   : > { %897 = vmatpush.msk.msra.mxu1 %vm225_vm0, %v220_v41  ;;  %v422_v44 = vsel %vm421_vm3, %v416_v42, %v418_v39 }
  0x95   : > { %910 = vmatpush.msk.msrb.mxu2 %vm225_vm0, %v422_v44  ;;  %898 = vmatmul.msk.f32.vlgmr.msra.gmra.mxu1 %vm221_vm1, %v894_v37  ;;  %vm392_vm11 = vcmp.lt.s32.totalorder %v185_v40, 1  ;;  %vm808_vm13 = vcmp.ge.s32.totalorder %v185_v40, 15 }
  0x96   : > { %911 = vmatmul.msk.f32.vlgmr.msrb.gmra.mxu2 %vm221_vm1, %v909_v43 }
  0x9a   : > { %v336_v45 = vpop.permute.xlu1 %335 }
  0x9b   : > { %v420_v46 = vpop.permute.xlu0 %419  ;;  %v341_v47 = vsel %vm339_vm4, %v336_v45, %v338_v34  ;;  %v548_v48 = vpop.permute.xlu2 %547 }
  0x9c   : > { %906 = vmatpush.msk.msrb.mxu1 %vm225_vm0, %v341_v47  ;;  %v423_v49 = vsel %vm421_vm3, %v418_v39, %v420_v46  ;;  %v178_v39 = vand.u32 15, %v172_v31 }
  0x9d   : > { %912 = vmatpush.msk.msrb.mxu3 %vm225_vm0, %v423_v49  ;;  %907 = vmatmul.msk.f32.vlgmr.msrb.gmra.mxu1 %vm221_vm1, %v903_v50 }
  0x9e   : > { %913 = vmatmul.msk.f32.vlgmr.msrb.gmra.mxu3 %vm221_vm1, %v909_v43  ;;  %vm391_vm10 = vcmp.lt.s32.totalorder %v178_v39, 1  ;;  %vm807_vm12 = vcmp.ge.s32.totalorder %v178_v39, 15 }
  0xa2   : > { %v334_v51 = vpop.permute.xlu1 %333 }
  0xa3   : > { %v340_v52 = vsel %vm339_vm4, %v334_v51, %v336_v45  ;;  %v546_v53 = vpop.permute.xlu2 %545 }
  0xa4   : > { %904 = vmatpush.msk.msrb.mxu0 %vm225_vm0, %v340_v52  ;;  %v552_v55 = vsel %vm551_vm5, %v546_v53, %v548_v48 }
  0xa5   : > { %919 = vmatpush.msk.msra.mxu2 %vm225_vm0, %v552_v55  ;;  %905 = vmatmul.msk.f32.vlgmr.msrb.gmra.mxu0 %vm221_vm1, %v903_v50  ;;  %v298_v22 = vpop.f32.mrf.mxu2  ;;  %v318_v23 = vpop.f32.mrf.mxu3 }
  0xa6   : > { %920 = vmatmul.msk.f32.vlgmr.msra.gmra.mxu2 %vm221_vm1, %v918_v54 }
  0xaa   : > { %v482_v56 = vpop.permute.xlu1 %481  ;;  %v480_v57 = vpop.permute.xlu0 %479 }
  0xab   : > { %v485_v58 = vsel %vm483_vm6, %v480_v57, %v482_v56  ;;  %v684_v59 = vpop.permute.xlu2 %683 }
  0xac   : > { %916 = vmatpush.msk.msra.mxu1 %vm225_vm0, %v485_v58 }
  0xad   : > { %917 = vmatmul.msk.f32.vlgmr.msra.gmra.mxu1 %vm221_vm1, %v908_v60 }
  0xb2   : > { %v550_v63 = vpop.permute.xlu0 %549  ;;  %v478_v0 = vpop.permute.xlu1 %477 }
  0xb3   : > { %v553_v1 = vsel %vm551_vm5, %v548_v48, %v550_v63  ;;  %v484_v2 = vsel %vm483_vm6, %v478_v0, %v480_v57  ;;  %v682_v3 = vpop.permute.xlu2 %681 }
  0xb4   : > { %914 = vmatpush.msk.msra.mxu0 %vm225_vm0, %v484_v2  ;;  %921 = vmatpush.msk.msra.mxu3 %vm225_vm0, %v553_v1  ;;  %v688_v4 = vsel %vm687_vm7, %v682_v3, %v684_v59 }
  0xb5   : > { %922 = vmatmul.msk.f32.vlgmr.msra.gmra.mxu3 %vm221_vm1, %v918_v54  ;;  %915 = vmatmul.msk.f32.vlgmr.msra.gmra.mxu0 %vm221_vm1, %v908_v60 }
  0xb6   : > { %929 = vmatpush.msk.msrb.mxu2 %vm225_vm0, %v688_v4 }
  0xb7   : > { %930 = vmatmul.msk.f32.vlgmr.msrb.gmra.mxu2 %vm221_vm1, %v923_v5 }
  0xba   : > { %v624_v6 = vpop.permute.xlu1 %623  ;;  %v622_v7 = vpop.permute.xlu0 %621 }
  0xbb   : > { %v627_v9 = vsel %vm625_vm8, %v622_v7, %v624_v6  ;;  %v750_v14 = vpop.permute.xlu2 %749 }
  0xbc   : > { %927 = vmatpush.msk.msrb.mxu1 %vm225_vm0, %v627_v9 }
  0xbd   : > { %928 = vmatmul.msk.f32.vlgmr.msrb.gmra.mxu1 %vm221_vm1, %v924_v8 }
  0xc2   : > { %v686_v10 = vpop.permute.xlu0 %685  ;;  %v620_v11 = vpop.permute.xlu1 %619 }
  0xc3   : > { %v689_v12 = vsel %vm687_vm7, %v684_v59, %v686_v10  ;;  %v626_v13 = vsel %vm625_vm8, %v620_v11, %v622_v7 }
  0xc4   : > { %925 = vmatpush.msk.msrb.mxu0 %vm225_vm0, %v626_v13  ;;  %931 = vmatpush.msk.msrb.mxu3 %vm225_vm0, %v689_v12 }
  0xc5   : > { %926 = vmatmul.msk.f32.vlgmr.msrb.gmra.mxu0 %vm221_vm1, %v924_v8  ;;  %932 = vmatmul.msk.f32.vlgmr.msrb.gmra.mxu3 %vm221_vm1, %v923_v5 }
  0xca   : > { %v754_v15 = vpop.permute.xlu1 %753  ;;  %v752_v16 = vpop.permute.xlu0 %751 }
  0xcb   : > { %v757_v18 = vsel %vm755_vm9, %v752_v16, %v754_v15  ;;  %v756_v19 = vsel %vm755_vm9, %v750_v14, %v752_v16 }
  0xcc   : > { %934 = vmatpush.msk.msra.mxu0 %vm225_vm0, %v756_v19  ;;  %936 = vmatpush.msk.msra.mxu1 %vm225_vm0, %v757_v18 }
  0xcd   : > { %935 = vmatmul.msk.f32.vlgmr.msra.gmra.mxu0 %vm221_vm1, %v933_v17  ;;  %937 = vmatmul.msk.f32.vlgmr.msra.gmra.mxu1 %vm221_vm1, %v933_v17 }
  0xd2   : > { %v821_v61 = vpop.permute.xlu0 %820 }
 0x10a   : > { %v247_v20 = vpop.f32.mrf.mxu0 }
 0x10b   : > { %v299_v37 = vadd.f32 %v298_v22, %v247_v20 }
 0x112   : > { %v267_v21 = vpop.f32.mrf.mxu1 }
 0x113   : > { %v319_v38 = vadd.f32 %v318_v23, %v267_v21 }
 0x119   : > { %v448_v26 = vpop.f32.mrf.mxu2 }
 0x11a   : > { %v386_v25 = vpop.f32.mrf.mxu1 }
 0x11b   : > { %v390_v45 = vadd.f32 %v386_v25, %v319_v38 }
 0x11d   : > { %v398_v54 = vsel %vm392_vm11, 0.0, %v390_v45 }
 0x121   : > { %v468_v27 = vpop.f32.mrf.mxu3 }
 0x122   : > { %v366_v24 = vpop.f32.mrf.mxu0 }
 0x123   : > { %v389_v44 = vadd.f32 %v366_v24, %v299_v37 }
 0x125   : > { %v397_v53 = vsel %vm391_vm10, 0.0, %v389_v44 }
 0x129   : > { %v578_v32 = vpop.f32.mrf.mxu2 }
 0x12a   : > { %v530_v29 = vpop.f32.mrf.mxu1 }
 0x12b   : > { %v531_v42 = vadd.f32 %v530_v29, %v468_v27 }
 0x132   : > { %v510_v30 = vpop.f32.mrf.mxu0 }
 0x133   : > { %v511_v41 = vadd.f32 %v510_v30, %v448_v26 }
 0x135   : > { %v601_v46 = vadd.f32 %v578_v32, %v511_v41 }
 0x137   : > { %v603_v57 = vadd.f32 %v601_v46, %v397_v53 }
 0x138   : > { %v598_v34 = vpop.f32.mrf.mxu3 }
 0x139   : > { %v602_v47 = vadd.f32 %v598_v34, %v531_v42 }
 0x13a   : > { %v672_v35 = vpop.f32.mrf.mxu1  ;;  %v714_v43 = vpop.f32.mrf.mxu2 }
 0x13b   : > { %v604_v58 = vadd.f32 %v602_v47, %v398_v54 }
 0x142   : > { %v652_v36 = vpop.f32.mrf.mxu0 }
 0x143   : > { %v715_v49 = vadd.f32 %v714_v43, %v652_v36 }
 0x148   : > { %v734_v48 = vpop.f32.mrf.mxu3 }
 0x149   : > { %v735_v50 = vadd.f32 %v734_v48, %v672_v35 }
 0x14a   : > { %v782_v51 = vpop.f32.mrf.mxu0  ;;  %v802_v52 = vpop.f32.mrf.mxu1 }
 0x14b   : > { %v805_v55 = vadd.f32 %v782_v51, %v715_v49  ;;  %v806_v56 = vadd.f32 %v802_v52, %v735_v50 }
 0x14d   : > { %v813_v59 = vsel %vm807_vm12, 0.0, %v805_v55  ;;  %v814_v60 = vsel %vm808_vm13, 0.0, %v806_v56 }
 0x14e   : > { %v816_v62 = vadd.f32 %v814_v60, %v604_v58  ;;  %v815_v63 = vadd.f32 %v813_v59, %v603_v57 }
 0x150   : > { %v824_v0 = vadd.f32 %v821_v61, %v816_v62  ;;  %v823_v1 = vadd.f32 %v821_v61, %v815_v63 }
 0x152   : > { %v827_v2 = vrot.slane %v824_v0, 4 }
 0x154   : > { %v828_v3 = vsel %vm225_vm0, %v823_v1, %v827_v2 }
 0x155   : > { %830 = vst [vmem:[%s170_s24] sm:$0xff] %v828_v3 }
 0x156 PF: > { %s13_s12 = sadd.s32 1, %s966_s12  }
 0x157   : > { %p10_p4 = scmp.ge.s32.totalorder %s13_s12, 4  }
 0x159   :  { %12 = sbr.rel (!%p10_p4) target bundleno = 1 (0x1), region = 78 }

</bundles_post_ra>
